<compile_context>
chip_gen: v6e
topology: v6e:2x2x1
jax: 0.10.0
libtpu: 0.0.40
codegen_flags: <defaults>
</compile_context>

<pallas_src>
import functools

import jax
import jax.numpy as jnp
from jax.experimental import pallas as pl
from jax.experimental.pallas import tpu as pltpu

LANES = 128              # lane width (last dim)
MAX_BLOCK_ROWS = 1024    # 1024x128 f32 = 512 KiB/input block; at the HBM
                         # roofline plateau and safe for v7x's smaller VMEM
NUM_PARALLEL = 2         # leading 'parallel' grid axis (v7x: 2 TensorCores)

# Loss-neutral padding: x=+100, t=1 -> bce = log1p(exp(-100)) ~ 4e-44 and
# pt == 1.0 exactly in f32, so a pad element contributes ~0 to the loss.
_PAD_X = 100.0
_PAD_T = 1.0


def _round_up(x, m):
    return ((x + m - 1) // m) * m


def _cdiv(a, b):
    return -(-a // b)


def _focal_elementwise(x, t, alpha, gamma):
    """Per-element focal loss in f32 (matches BCEWithLogits + focal weight)."""
    # Numerically stable BCE with logits:
    #   bce = max(x, 0) - x*t + log1p(exp(-|x|))
    bce = jnp.maximum(x, 0.0) - x * t + jnp.log1p(jnp.exp(-jnp.abs(x)))
    pt = jnp.exp(-bce)
    one_minus_pt = 1.0 - pt
    g = float(gamma)
    if g == int(g) and 0 <= int(g) <= 8:
        gi = int(g)
        mod = jnp.ones_like(one_minus_pt) if gi == 0 else one_minus_pt
        for _ in range(max(gi - 1, 0)):
            mod = mod * one_minus_pt          # integer-power unroll (VPU only)
    else:
        mod = one_minus_pt ** g               # non-integer gamma fallback
    return alpha * mod * bce


def _focal_sum_kernel(x_ref, t_ref, o_ref, acc_ref, *, alpha, gamma, block_rows):
    i = pl.program_id(1)                      # reduction-step axis

    @pl.when(i == 0)
    def _():
        acc_ref[...] = jnp.zeros_like(acc_ref)

    x = x_ref[...].astype(jnp.float32)
    t = t_ref[...].astype(jnp.float32)
    f_loss = _focal_elementwise(x, t, alpha, gamma)
    # Fold the tile into a vreg-shaped accumulator with plain vector adds; the
    # expensive full cross-lane reduce happens once, outside the kernel.
    acc_ref[...] += jnp.sum(f_loss.reshape(block_rows // 8, 8, LANES), axis=0)
    o_ref[...] = acc_ref[...]


def _focal_none_kernel(x_ref, t_ref, o_ref, *, alpha, gamma):
    x = x_ref[...].astype(jnp.float32)
    t = t_ref[...].astype(jnp.float32)
    o_ref[...] = _focal_elementwise(x, t, alpha, gamma).astype(o_ref.dtype)


def focal_loss(inputs, targets, alpha=0.25, gamma=2.0, reduction="mean"):
    """Pallas TPU focal loss. inputs/targets: same arbitrary shape."""
    assert inputs.shape == targets.shape
    assert reduction in ("mean", "sum", "none")

    n_valid = int(inputs.size)
    rows = _cdiv(n_valid, LANES)
    block_rows = min(MAX_BLOCK_ROWS, _round_up(rows, 8))
    n_blocks = _cdiv(rows, block_rows)
    n_cores = min(NUM_PARALLEL, n_blocks)
    steps = _cdiv(n_blocks, n_cores)
    padded_rows = n_cores * steps * block_rows
    pad_len = padded_rows * LANES - n_valid

    # Keep native dtype; cast to f32 inside the kernel.
    x = jnp.ravel(inputs)
    t = jnp.ravel(targets)
    if pad_len:  # aligned case skips the extra HBM copy entirely
        x = jnp.pad(x, (0, pad_len), constant_values=_PAD_X)
        t = jnp.pad(t, (0, pad_len), constant_values=_PAD_T)
    x = x.reshape(padded_rows, LANES)
    t = t.reshape(padded_rows, LANES)

    in_spec = pl.BlockSpec((block_rows, LANES), lambda p, i: (p * steps + i, 0))
    params = pltpu.CompilerParams(dimension_semantics=("parallel", "arbitrary"))

    if reduction == "none":
        kernel = functools.partial(_focal_none_kernel,
                                   alpha=float(alpha), gamma=float(gamma))
        out = pl.pallas_call(
            kernel,
            out_shape=jax.ShapeDtypeStruct((padded_rows, LANES), jnp.float32),
            grid_spec=pltpu.PrefetchScalarGridSpec(
                num_scalar_prefetch=0,
                grid=(n_cores, steps),
                in_specs=[in_spec, in_spec],
                out_specs=pl.BlockSpec((block_rows, LANES),
                                       lambda p, i: (p * steps + i, 0)),
            ),
            compiler_params=params,
        )(x, t)
        return out.reshape(-1)[:n_valid].reshape(inputs.shape)

    kernel = functools.partial(_focal_sum_kernel, alpha=float(alpha),
                               gamma=float(gamma), block_rows=block_rows)
    partials = pl.pallas_call(
        kernel,
        out_shape=jax.ShapeDtypeStruct((n_cores * 8, LANES), jnp.float32),
        grid_spec=pltpu.PrefetchScalarGridSpec(
            num_scalar_prefetch=0,
            grid=(n_cores, steps),
            in_specs=[in_spec, in_spec],
            out_specs=pl.BlockSpec((8, LANES), lambda p, i: (p, 0)),
            scratch_shapes=[pltpu.VMEM((8, LANES), jnp.float32)],
        ),
        compiler_params=params,
    )(x, t)
    total = jnp.sum(partials)               # tiny final reduce in XLA
    if reduction == "mean":
        return total / jnp.float32(n_valid)
    return total


def focal_loss_ref_none(inputs, targets, alpha=0.25, gamma=2.0):
    x = inputs.astype(jnp.float32)
    t = targets.astype(jnp.float32)
    bce = jnp.maximum(x, 0.0) - x * t + jnp.log1p(jnp.exp(-jnp.abs(x)))
    pt = jnp.exp(-bce)
    return alpha * (1.0 - pt) ** gamma * bce


if __name__ == "__main__":
    key = jax.random.PRNGKey(0)
    k1, k2, k3, k4, k5, k6 = jax.random.split(key, 6)

    # Primary small case (NCHW-style logits), lane-aligned.
    shape = (2, 4, 16, 16)
    logits = jax.random.normal(k1, shape, dtype=jnp.float32)
    targets = jax.random.uniform(k2, shape, dtype=jnp.float32)

    loss_mean = jax.block_until_ready(focal_loss(logits, targets, 0.25, 2.0, "mean"))
    loss_sum = jax.block_until_ready(focal_loss(logits, targets, 0.25, 2.0, "sum"))
    loss_none = jax.block_until_ready(focal_loss(logits, targets, 0.25, 2.0, "none"))

    ref_none = focal_loss_ref_none(logits, targets)
    assert jnp.allclose(loss_mean, jnp.mean(ref_none), rtol=1e-5, atol=1e-6), (
        loss_mean, jnp.mean(ref_none))
    assert jnp.allclose(loss_sum, jnp.sum(ref_none), rtol=1e-5, atol=1e-5), (
        loss_sum, jnp.sum(ref_none))
    assert jnp.allclose(loss_none, ref_none, rtol=1e-5, atol=1e-6)

    # Ragged case (exercises loss-neutral padding path).
    shape2 = (3, 5, 7)
    logits2 = jax.random.normal(k3, shape2, dtype=jnp.float32)
    targets2 = jax.random.uniform(k4, shape2, dtype=jnp.float32)
    loss2 = jax.block_until_ready(focal_loss(logits2, targets2, 0.25, 2.0, "mean"))
    ref2 = jnp.mean(focal_loss_ref_none(logits2, targets2))
    assert jnp.allclose(loss2, ref2, rtol=1e-5, atol=1e-6), (loss2, ref2)

    # Larger sanity check (exercises the 2-D grid: parallel shards + steps).
    shape3 = (2, 16, 128, 128)
    logits3 = jax.random.normal(k5, shape3, dtype=jnp.float32)
    targets3 = jax.random.uniform(k6, shape3, dtype=jnp.float32)
    loss3 = jax.block_until_ready(focal_loss(logits3, targets3, 0.25, 2.0, "mean"))
    ref3 = jnp.mean(focal_loss_ref_none(logits3, targets3))
    assert jnp.allclose(loss3, ref3, rtol=1e-4, atol=1e-6), (loss3, ref3)

    print("KERNEL_OK")
</pallas_src>

<mosaic_0001>
module attributes {stable_mosaic.version = 11 : i64} {
  func.func @_focal_sum_kernel(%arg0: i32, %arg1: i32, %arg2: memref<16x128xf32, #tpu.memory_space<vmem>>, %arg3: memref<16x128xf32, #tpu.memory_space<vmem>>, %arg4: memref<8x128xf32, #tpu.memory_space<vmem>>, %arg5: memref<8x128xf32, #tpu.memory_space<vmem>>) attributes {dimension_semantics = [#tpu.dimension_semantics<parallel>, #tpu.dimension_semantics<arbitrary>], iteration_bounds = array<i64: 1, 1>, scalar_prefetch = 0 : i64, scratch_operands = 1 : i64, tpu.core_type = #tpu.core_type<tc>, window_params = [{transform_indices = @transform_0, window_bounds = array<i64: 16, 128>}, {transform_indices = @transform_1, window_bounds = array<i64: 16, 128>}, {transform_indices = @transform_2, window_bounds = array<i64: 8, 128>}]} {
    %c0_i32 = arith.constant 0 : i32
    %0 = arith.cmpi eq, %arg1, %c0_i32 : i32
    %1 = arith.extui %0 : i1 to i32
    %c0_i32_0 = arith.constant 0 : i32
    %2 = arith.cmpi ne, %1, %c0_i32_0 : i32
    scf.if %2 {
      %cst_17 = arith.constant 0.000000e+00 : f32
      %31 = vector.broadcast %cst_17 : f32 to vector<8x128xf32>
      %c0_18 = arith.constant 0 : index
      %c0_19 = arith.constant 0 : index
      %32 = vector.load %arg5[%c0_18, %c0_19] : memref<8x128xf32, #tpu.memory_space<vmem>>, vector<8x128xf32>
      tpu.vector_store %arg5[%c0_18, %c0_19], %31 {strides = array<i32>} : memref<8x128xf32, #tpu.memory_space<vmem>>, vector<8x128xf32>,
    } else {
    }
    %c0 = arith.constant 0 : index
    %c0_1 = arith.constant 0 : index
    %3 = vector.load %arg2[%c0, %c0_1] : memref<16x128xf32, #tpu.memory_space<vmem>>, vector<16x128xf32>
    %c0_2 = arith.constant 0 : index
    %c0_3 = arith.constant 0 : index
    %4 = vector.load %arg3[%c0_2, %c0_3] : memref<16x128xf32, #tpu.memory_space<vmem>>, vector<16x128xf32>
    %cst = arith.constant 0.000000e+00 : f32
    %5 = vector.broadcast %cst : f32 to vector<16x128xf32>
    %6 = arith.maximumf %3, %5 : vector<16x128xf32>
    %7 = arith.mulf %3, %4 : vector<16x128xf32>
    %8 = arith.subf %6, %7 : vector<16x128xf32>
    %9 = math.absf %3 : vector<16x128xf32>
    %cst_4 = arith.constant 0.000000e+00 : f32
    %10 = vector.broadcast %cst_4 : f32 to vector<16x128xf32>
    %11 = arith.subf %10, %9 : vector<16x128xf32>
    %12 = math.exp %11 : vector<16x128xf32>
    %13 = math.log1p %12 : vector<16x128xf32>
    %14 = arith.addf %8, %13 : vector<16x128xf32>
    %cst_5 = arith.constant 0.000000e+00 : f32
    %15 = vector.broadcast %cst_5 : f32 to vector<16x128xf32>
    %16 = arith.subf %15, %14 : vector<16x128xf32>
    %17 = math.exp %16 : vector<16x128xf32>
    %cst_6 = arith.constant 1.000000e+00 : f32
    %18 = vector.broadcast %cst_6 : f32 to vector<16x128xf32>
    %19 = arith.subf %18, %17 : vector<16x128xf32>
    %20 = arith.mulf %19, %19 : vector<16x128xf32>
    %cst_7 = arith.constant 2.500000e-01 : f32
    %21 = vector.broadcast %cst_7 : f32 to vector<16x128xf32>
    %22 = arith.mulf %21, %20 : vector<16x128xf32>
    %23 = arith.mulf %22, %14 : vector<16x128xf32>
    %c0_8 = arith.constant 0 : index
    %c0_9 = arith.constant 0 : index
    %24 = vector.load %arg5[%c0_8, %c0_9] : memref<8x128xf32, #tpu.memory_space<vmem>>, vector<8x128xf32>
    %25 = vector.shape_cast %23 : vector<16x128xf32> to vector<2x8x128xf32>
    %cst_10 = arith.constant dense<0.000000e+00> : vector<8x128xf32>
    %26 = vector.multi_reduction <add>, %25, %cst_10 [0] : vector<2x8x128xf32> to vector<8x128xf32>
    %27 = arith.addf %24, %26 : vector<8x128xf32>
    %c0_11 = arith.constant 0 : index
    %c0_12 = arith.constant 0 : index
    %28 = vector.load %arg5[%c0_11, %c0_12] : memref<8x128xf32, #tpu.memory_space<vmem>>, vector<8x128xf32>
    tpu.vector_store %arg5[%c0_11, %c0_12], %27 {strides = array<i32>} : memref<8x128xf32, #tpu.memory_space<vmem>>, vector<8x128xf32>,
    %c0_13 = arith.constant 0 : index
    %c0_14 = arith.constant 0 : index
    %29 = vector.load %arg5[%c0_13, %c0_14] : memref<8x128xf32, #tpu.memory_space<vmem>>, vector<8x128xf32>
    %c0_15 = arith.constant 0 : index
    %c0_16 = arith.constant 0 : index
    %30 = vector.load %arg4[%c0_15, %c0_16] : memref<8x128xf32, #tpu.memory_space<vmem>>, vector<8x128xf32>
    tpu.vector_store %arg4[%c0_15, %c0_16], %29 {strides = array<i32>} : memref<8x128xf32, #tpu.memory_space<vmem>>, vector<8x128xf32>,
    return
  }
  func.func @transform_0(%arg0: i32, %arg1: i32) -> (i32, i32) {
    %c1_i32 = arith.constant 1 : i32
    %0 = arith.muli %arg0, %c1_i32 : i32
    %1 = arith.addi %0, %arg1 : i32
    %c0_i32 = arith.constant 0 : i32
    %c0_i32_0 = arith.constant 0 : i32
    return %1, %c0_i32 : i32, i32
  }
  func.func @transform_1(%arg0: i32, %arg1: i32) -> (i32, i32) {
    %c1_i32 = arith.constant 1 : i32
    %0 = arith.muli %arg0, %c1_i32 : i32
    %1 = arith.addi %0, %arg1 : i32
    %c0_i32 = arith.constant 0 : i32
    %c0_i32_0 = arith.constant 0 : i32
    return %1, %c0_i32 : i32, i32
  }
  func.func @transform_2(%arg0: i32, %arg1: i32) -> (i32, i32) {
    %c0_i32 = arith.constant 0 : i32
    %c0_i32_0 = arith.constant 0 : i32
    return %arg0, %c0_i32 : i32, i32
  }
}

</mosaic_0001>

<bundles_post_ra>
// kernel: tpu_custom_call.1
= control target key start
LH: loop header
LB: loop body
LE: loop exit
PB: predicated region body
PF: predicated region fallthrough
CT: control target
= control target key end

     0   :  { %7 = vsyncpa [#allocation4], 0  ;;  %s243_s0 = inlined_call_operand.hbm [shape: f32[16,128], index: 0, kind: input, shape index: {}]   ;;  %s244_s1 = inlined_call_operand.hbm [shape: f32[16,128], index: 1, kind: input, shape index: {}]   ;;  %s245_s2 = inlined_call_operand.hbm [shape: f32[8,128], index: 2, kind: output, shape index: {}]  }
   0x1   :  { %8 = vsyncpa [#allocation7], 0 }
   0x2   :  { %9 = vsyncpa [#allocation5], 0  ;;  %s214_s9 = smov [#allocation3]  }
   0x3   :  { %s19_s10 = sshll.u32 %s214_s9, 4  ;;  %s20_s10 = int_to_ptr.vmem [resolvable:$true] %s19_s10 }
   0x4   :  { %s156_s11 = scalar_lea.vmem %s20_s10, 256  ;;  %p161_p1 = scmp.lt.s32.totalorder %s20_s10, %s20_s10 }
   0x5   :  { %p157_p0 = scmp.ne.s32.totalorder %s20_s10, %s156_s11  ;;  %p162_p2 = scmp.lt.s32.totalorder %s156_s11, %s156_s11 }
   0x7   :  { %p163_p3 = por %p162_p2, %p161_p1 }
   0x9   :  { %p164_p4 = pnand %p163_p3, %p157_p0 }
   0xb   :  { %167 = shalt.err (!%p164_p4)
}
   0xc   :  { %s215_s12 = smov 128   ;;  %s216_s13 = smov 8  }
   0xd   :  { %25 = dma.hbm_to_vmem [thread:$0]  %s243_s0, 256, %s20_s10, [#allocation4], %s215_s12, %s215_s12, %s216_s13  }
   0xe   :  { %s217_s16 = smov [#allocation6]  }
   0xf   :  { %s35_s17 = sshll.u32 %s217_s16, 4  ;;  %s36_s17 = int_to_ptr.vmem [resolvable:$true] %s35_s17 }
  0x10   :  { %s176_s18 = scalar_lea.vmem %s36_s17, 256  ;;  %p181_p6 = scmp.lt.s32.totalorder %s36_s17, %s36_s17 }
  0x11   :  { %p177_p5 = scmp.ne.s32.totalorder %s36_s17, %s176_s18  ;;  %p182_p7 = scmp.lt.s32.totalorder %s176_s18, %s176_s18 }
  0x13   :  { %p183_p8 = por %p182_p7, %p181_p6 }
  0x15   :  { %p184_p9 = pnand %p183_p8, %p177_p5 }
  0x17   :  { %187 = shalt.err (!%p184_p9)
}
  0x18   :  { %41 = dma.hbm_to_vmem [thread:$0]  %s244_s1, 256, %s36_s17, [#allocation7], %s215_s12, %s215_s12, %s216_s13  }
  0x19   :  { %208 = dma.done.wait [#allocation4], 256  }
  0x1a   :  { %209 = vsyncadd [#allocation4], 4294967040 }
  0x1b   :  { %210 = dma.done.wait [#allocation7], 256  }
  0x1c   :  { %211 = vsyncadd [#allocation7], 4294967040  ;;  %v57_v0 = vld [vmem:[#allocation3] sm:$0xff]  ;;  %v58_v1 = vld [vmem:[#allocation3 + $0x8] sm:$0xff]  ;;  %s218_s0 = smov [#allocation8]  }
  0x1d   :  { %v67_v2 = vand.u32 2147483647, %v57_v0  ;;  %v68_v3 = vand.u32 2147483647, %v58_v1  ;;  %v59_v14 = vld [vmem:[#allocation6] sm:$0xff]  ;;  %v60_v15 = vld [vmem:[#allocation6 + $0x8] sm:$0xff] }
  0x1e   :  { %v61_v17 = vmax.f32 %v57_v0, 0.0  ;;  %v63_v18 = vmul.f32 %v59_v14, %v57_v0  ;;  %v62_v21 = vmax.f32 %v58_v1, 0.0  ;;  %v64_v22 = vmul.f32 %v60_v15, %v58_v1  ;;  %s121_s1 = sshll.u32 %s218_s0, 4  ;;  %s122_s1 = int_to_ptr.vmem [resolvable:$true] %s121_s1 }
  0x1f   :  { %v69_v4 = vsub.f32 0.0, %v67_v2  ;;  %v70_v5 = vsub.f32 0.0, %v68_v3  ;;  %s188_s21 = scalar_lea.vmem %s122_s1, 128  ;;  %p193_p11 = scmp.lt.s32.totalorder %s122_s1, %s122_s1 }
  0x20   :  { %v65_v26 = vsub.f32 %v61_v17, %v63_v18  ;;  %v66_v29 = vsub.f32 %v62_v21, %v64_v22  ;;  %p189_p10 = scmp.ne.s32.totalorder %s122_s1, %s188_s21  ;;  %p194_p12 = scmp.lt.s32.totalorder %s188_s21, %s188_s21 }
  0x21   :  { %v71_v6 = vmul.f32 1.442695, %v69_v4  ;;  %v73_v7 = vmul.f32 1.442695, %v70_v5 }
  0x22   :  { %p195_p13 = por %p194_p12, %p193_p11 }
  0x23   :  { %136 = vpow2.f32 %v71_v6 }
  0x24   :  { %138 = vpow2.f32 %v73_v7  ;;  %p196_p0 = pnand %p195_p13, %p189_p10 }
  0x30   :  { %v137_v8 = vpop.eup %136 }
  0x31   :  { %v139_v9 = vpop.eup %138  ;;  %v75_v10 = vadd.f32 1.0, %v137_v8  ;;  %v78_v12 = vmul.f32 -0.5, %v137_v8  ;;  %v81_v19 = vand.u32 2147483647, %v137_v8 }
  0x32   :  { %v84_v11 = vadd.f32 1.0, %v139_v9  ;;  %v87_v13 = vmul.f32 -0.5, %v139_v9  ;;  %v90_v23 = vand.u32 2147483647, %v139_v9 }
  0x33   :  { %140 = vlog2.f32 %v75_v10  ;;  %v79_v16 = vadd.f32 1.0, %v78_v12  ;;  %vm82_vm0 = vcmp.lt.f32.partialorder %v81_v19, 0.0004427343 }
  0x34   :  { %142 = vlog2.f32 %v84_v11  ;;  %v88_v20 = vadd.f32 1.0, %v87_v13  ;;  %vm91_vm1 = vcmp.lt.f32.partialorder %v90_v23, 0.0004427343 }
  0x35   :  { %v80_v24 = vmul.f32 %v137_v8, %v79_v16 }
  0x36   :  { %v89_v27 = vmul.f32 %v139_v9, %v88_v20 }
  0x40   :  { %v141_v25 = vpop.eup %140 }
  0x41   :  { %v143_v28 = vpop.eup %142  ;;  %v77_v30 = vmul.f32 0.6931472, %v141_v25 }
  0x42   :  { %v86_v31 = vmul.f32 0.6931472, %v143_v28 }
  0x43   :  { %v83_v32 = vsel %vm82_vm0, %v80_v24, %v77_v30 }
  0x44   :  { %v92_v33 = vsel %vm91_vm1, %v89_v27, %v86_v31  ;;  %v93_v34 = vadd.f32 %v83_v32, %v65_v26 }
  0x45   :  { %v94_v35 = vadd.f32 %v92_v33, %v66_v29 }
  0x46   :  { %v95_v36 = vsub.f32 0.0, %v93_v34 }
  0x47   :  { %v96_v37 = vsub.f32 0.0, %v94_v35 }
  0x48   :  { %v97_v38 = vmul.f32 1.442695, %v95_v36 }
  0x49   :  { %v99_v39 = vmul.f32 1.442695, %v96_v37 }
  0x4a   :  { %144 = vpow2.f32 %v97_v38 }
  0x4b   :  { %146 = vpow2.f32 %v99_v39 }
  0x57   :  { %v145_v40 = vpop.eup %144 }
  0x58   :  { %v147_v41 = vpop.eup %146  ;;  %v101_v42 = vsub.f32 1.0, %v145_v40 }
  0x59   :  { %v102_v43 = vsub.f32 1.0, %v147_v41 }
  0x5a   :  { %v103_v44 = vmul.f32 %v101_v42, %v101_v42 }
  0x5b   :  { %v104_v45 = vmul.f32 %v102_v43, %v102_v43 }
  0x5c   :  { %v105_v46 = vmul.f32 0.25, %v103_v44 }
  0x5d   :  { %v106_v47 = vmul.f32 0.25, %v104_v45 }
  0x5e   :  { %v107_v48 = vmul.f32 %v105_v46, %v93_v34 }
  0x5f   :  { %v108_v49 = vmul.f32 %v106_v47, %v94_v35 }
  0x61   :  { %v110_v50 = vadd.f32 %v108_v49, %v107_v48 }
  0x63   :  { %114 = vst [vmem:[#allocation8] sm:$0xff] %v110_v50 }
  0x64   :  { %199 = shalt.err (!%p196_p0)
}
  0x65   :  { %124 = dma.vmem_to_hbm [thread:$0]  %s122_s1, 128, %s245_s2, [#allocation5]  }
  0x66   :  { %212 = dma.done.wait [#allocation5], 128  }
  0x67   :  { %213 = vsyncadd [#allocation5], 4294967168 }
  0x68   :  { %128 = vsyncpa [#allocation4], 1 }
  0x69   :  { %129 = vsyncpa [#allocation7], 1 }
  0x6a   :  { %130 = vsyncpa [#allocation5], 1 }

</bundles_post_ra>
